<compile_context>
chip_gen: v7x
topology: tpu7x:2x2x1
jax: 0.10.0
libtpu: 0.0.40
codegen_flags: <defaults>
</compile_context>

<pallas_src>
import jax
import jax.numpy as jnp
from jax.experimental import pallas as pl
from jax.experimental.pallas import tpu as pltpu


def _attention_kernel(x_ref, w_ref, o_ref):
    # x_ref: (TB, S, D) tile, w_ref: (1, D) lane-major weights, o_ref: (TB, D)
    x = x_ref[...].astype(jnp.float32)            # (TB, S, D)
    w = w_ref[...].astype(jnp.float32)            # (1, D), broadcasts over (TB, S, D)

    # Attention scores on the VPU/XLU (no N=1 MXU matmul).
    # 2D (TB, S) softmax statistics: denser vregs than (TB, S, 1).
    scores = jnp.sum(x * w, axis=-1)              # (TB, S)

    # Max-stabilized softmax over the sequence axis S.
    m = jnp.max(scores, axis=-1, keepdims=True)   # (TB, 1)
    e = jnp.exp(scores - m)                       # (TB, S)
    denom = jnp.sum(e, axis=-1, keepdims=True)    # (TB, 1)

    # Fold normalization into the finalize: accumulate the un-normalized
    # weighted sum, then divide the small (TB, D) result exactly.
    acc = jnp.sum(x * e[:, :, None], axis=1)      # (TB, D)
    o_ref[...] = (acc / denom).astype(o_ref.dtype)


def _block_rows(bg, padded_row_bytes, target_bytes):
    """Rows of (S, D) per grid step.

    Returns a multiple of 8 (sublane-aligned output block) that divides BG so
    the wrapper never materializes a padded copy of x; falls back to a single
    full-extent block (tb == BG) when BG has no such divisor.
    """
    cap = max(8, int(target_bytes // max(padded_row_bytes, 1)))
    if bg >= 32:
        cap = min(cap, bg // 4)   # >= 4 grid steps -> >= 2 per TC on v7x
    elif bg >= 16:
        cap = min(cap, bg // 2)   # >= 2 grid steps so pipelining exists at all

    best = None
    t = 8
    limit = min(cap, bg)
    while t <= limit:
        if bg % t == 0:
            best = t
        t += 8
    return best if best is not None else bg


def attention_layer(x, attention_weights, *, target_block_bytes=4 * 1024 * 1024):
    """x: [B, G, S, D], attention_weights: [D, 1] -> [B, G, D]."""
    B, G, S, D = x.shape
    BG = B * G
    x_flat = x.reshape(BG, S, D)
    w_row = attention_weights.reshape(1, D)       # lane-major weights

    # Size blocks by their *resident* VMEM footprint (D pads to 128 lanes).
    padded_d = -(-D // 128) * 128
    padded_row_bytes = S * padded_d * x_flat.dtype.itemsize
    tb = _block_rows(BG, padded_row_bytes, target_block_bytes)
    n_blocks = BG // tb                            # tb divides BG; no padding ever

    block_bytes = tb * padded_row_bytes
    # Double-buffered input + output + headroom; clamp below v7x's 64 MiB VMEM.
    vmem_limit = int(min(max(6 * block_bytes, 32 * 1024 * 1024),
                         48 * 1024 * 1024))

    out = pl.pallas_call(
        _attention_kernel,
        out_shape=jax.ShapeDtypeStruct((BG, D), x.dtype),
        grid_spec=pltpu.PrefetchScalarGridSpec(
            num_scalar_prefetch=0,
            grid=(n_blocks,),
            in_specs=[
                pl.BlockSpec((tb, S, D), lambda i: (i, 0, 0)),  # TB (S, D) slices
                pl.BlockSpec((1, D), lambda i: (0, 0)),         # weights, resident
            ],
            out_specs=pl.BlockSpec((tb, D), lambda i: (i, 0)),  # lane-dense 2D out
        ),
        compiler_params=pltpu.CompilerParams(
            dimension_semantics=("parallel",),
            vmem_limit_bytes=vmem_limit,
        ),
    )(x_flat, w_row)

    return out.reshape(B, G, D)


def _reference(x, w):
    scores = jnp.einsum("bgsd,de->bgse", x, w)
    scores = jax.nn.softmax(scores, axis=2)
    return jnp.sum(x * scores, axis=2)


if __name__ == "__main__":
    key = jax.random.PRNGKey(0)
    kx, kw = jax.random.split(key)

    B, G, S, D = 4, 4, 8, 32          # feature_dim = 32; BG=16 -> tb=8, 2 grid steps
    x = jax.random.normal(kx, (B, G, S, D), dtype=jnp.float32)
    attention_weights = jax.random.normal(kw, (D, 1), dtype=jnp.float32)

    out = attention_layer(x, attention_weights)
    out = jax.block_until_ready(out)

    ref = _reference(x, attention_weights)
    assert out.shape == (B, G, D)
    assert jnp.allclose(out, ref, atol=1e-4, rtol=1e-4), float(
        jnp.max(jnp.abs(out - ref))
    )

    print("KERNEL_OK")
</pallas_src>

<mosaic_0001>
module attributes {stable_mosaic.version = 11 : i64} {
  func.func @_attention_kernel(%arg0: i32, %arg1: memref<8x8x32xf32, #tpu.memory_space<vmem>>, %arg2: memref<1x32xf32, #tpu.memory_space<vmem>>, %arg3: memref<8x32xf32, #tpu.memory_space<vmem>>) attributes {dimension_semantics = [#tpu.dimension_semantics<parallel>], iteration_bounds = array<i64: 2>, scalar_prefetch = 0 : i64, scratch_operands = 0 : i64, tpu.core_type = #tpu.core_type<tc>, window_params = [{transform_indices = @transform_0, window_bounds = array<i64: 8, 8, 32>}, {pipeline_mode = #tpu.pipeline_mode<synchronous>, transform_indices = @transform_1, window_bounds = array<i64: 1, 32>}, {transform_indices = @transform_2, window_bounds = array<i64: 8, 32>}]} {
    %c0 = arith.constant 0 : index
    %c0_0 = arith.constant 0 : index
    %c0_1 = arith.constant 0 : index
    %0 = vector.load %arg1[%c0, %c0_0, %c0_1] : memref<8x8x32xf32, #tpu.memory_space<vmem>>, vector<8x8x32xf32>
    %c0_2 = arith.constant 0 : index
    %c0_3 = arith.constant 0 : index
    %1 = vector.load %arg2[%c0_2, %c0_3] : memref<1x32xf32, #tpu.memory_space<vmem>>, vector<1x32xf32>
    %2 = vector.shape_cast %1 : vector<1x32xf32> to vector<1x1x32xf32>
    %3 = vector.broadcast %2 : vector<1x1x32xf32> to vector<8x8x32xf32>
    %4 = arith.mulf %0, %3 : vector<8x8x32xf32>
    %cst = arith.constant dense<0.000000e+00> : vector<8x8xf32>
    %5 = vector.multi_reduction <add>, %4, %cst [2] : vector<8x8x32xf32> to vector<8x8xf32>
    %cst_4 = arith.constant dense<0xFF800000> : vector<8xf32>
    %6 = vector.multi_reduction <maximumf>, %5, %cst_4 [1] : vector<8x8xf32> to vector<8xf32>
    %7 = vector.shape_cast %6 : vector<8xf32> to vector<8x1xf32>
    %8 = vector.broadcast %7 : vector<8x1xf32> to vector<8x8xf32>
    %9 = arith.subf %5, %8 : vector<8x8xf32>
    %10 = math.exp %9 : vector<8x8xf32>
    %cst_5 = arith.constant dense<0.000000e+00> : vector<8xf32>
    %11 = vector.multi_reduction <add>, %10, %cst_5 [1] : vector<8x8xf32> to vector<8xf32>
    %12 = vector.shape_cast %11 : vector<8xf32> to vector<8x1xf32>
    %13 = vector.shape_cast %10 : vector<8x8xf32> to vector<8x8x1xf32>
    %14 = vector.broadcast %13 : vector<8x8x1xf32> to vector<8x8x32xf32>
    %15 = arith.mulf %0, %14 : vector<8x8x32xf32>
    %cst_6 = arith.constant dense<0.000000e+00> : vector<8x32xf32>
    %16 = vector.multi_reduction <add>, %15, %cst_6 [1] : vector<8x8x32xf32> to vector<8x32xf32>
    %17 = vector.broadcast %12 : vector<8x1xf32> to vector<8x32xf32>
    %18 = arith.divf %16, %17 : vector<8x32xf32>
    %c0_7 = arith.constant 0 : index
    %c0_8 = arith.constant 0 : index
    %19 = vector.load %arg3[%c0_7, %c0_8] : memref<8x32xf32, #tpu.memory_space<vmem>>, vector<8x32xf32>
    tpu.vector_store %arg3[%c0_7, %c0_8], %18 {strides = array<i32>} : memref<8x32xf32, #tpu.memory_space<vmem>>, vector<8x32xf32>,
    return
  }
  func.func @transform_0(%arg0: i32) -> (i32, i32, i32) {
    %c0_i32 = arith.constant 0 : i32
    %c0_i32_0 = arith.constant 0 : i32
    %c0_i32_1 = arith.constant 0 : i32
    return %arg0, %c0_i32, %c0_i32_0 : i32, i32, i32
  }
  func.func @transform_1(%arg0: i32) -> (i32, i32) {
    %c0_i32 = arith.constant 0 : i32
    %c0_i32_0 = arith.constant 0 : i32
    %c0_i32_1 = arith.constant 0 : i32
    return %c0_i32, %c0_i32_0 : i32, i32
  }
  func.func @transform_2(%arg0: i32) -> (i32, i32) {
    %c0_i32 = arith.constant 0 : i32
    %c0_i32_0 = arith.constant 0 : i32
    return %arg0, %c0_i32 : i32, i32
  }
}

</mosaic_0001>

<bundles_post_ra>
// kernel: tpu_custom_call.1
= control target key start
LH: loop header
LB: loop body
LE: loop exit
PB: predicated region body
PF: predicated region fallthrough
CT: control target
= control target key end

     0   :  { %7 = vsyncpa [#allocation3], 0  ;;  %s1105_s0 = inlined_call_operand.hbm [shape: f32[16,8,32], index: 0, kind: input, shape index: {}]   ;;  %s1106_s1 = inlined_call_operand.vmem [shape: f32[1,32], index: 1, kind: input, shape index: {}]   ;;  %s1107_s2 = inlined_call_operand.hbm [shape: f32[16,32], index: 2, kind: output, shape index: {}]  }
   0x1   :  { %9 = vsyncpa [#allocation3 + $0x1], 0 }
   0x2   :  { %10 = vsyncpa [#allocation4], 0 }
   0x3   :  { %12 = vsyncpa [#allocation4 + $0x1], 0  ;;  %s840_s9 = smov 0   ;;  %s842_s10 = smov 0  }
   0x4   :  { %s844_s11 = smov 0   ;;  %s846_s12 = smov 0  }
   0x5 LB: > { %s861_s13 = sadd.s32 4294967295, %s818_s12   ;;  %s624_s14 = sadd.s32 4294967294, %s818_s12   ;;  %s818_s12 = sphi %s846_s12, %s1120_s12   ;;  %s814_s11 = sphi %s844_s11, %s1119_s11   ;;  %s810_s10 = sphi %s842_s10, %s1118_s10   ;;  %s806_s9 = sphi %s840_s9, %s1117_s9  }
   0x6   : > { %s865_s15 = sadd.s32 1, %s818_s12   ;;  %s25_s16 = sadd.s32 1, %s814_s11 }
   0x7   : > { %s22_s17 = ssub.s32 %s818_s12, %s865_s15  ;;  %p32_p0 = scmp.ne.s32.totalorder %s814_s11, %s810_s10 }
   0x8   : > { %p23_p1 = scmp.eq.s32.totalorder %s22_s17, 0  ;;  %p33_p2 = scmp.eq.s32.totalorder %s818_s12, 0 }
   0x9   : > { %p38_p3 = scmp.ne.s32.totalorder %s810_s10, %s806_s9  ;;  %p39_p4 = scmp.eq.s32.totalorder %s861_s13, 0 }
   0xa   : > { %s877_s18 = scalar_select %p23_p1, %s814_s11, %s25_s16  }
   0xb   : > { %p879_p5 = por %p33_p2, %p32_p0  ;;  %p883_p6 = por %p39_p4, %p38_p3 }
   0xc   : > { %p83_p7 = scmp.eq.s32.totalorder %s861_s13, 1  ;;  %p89_p8 = scmp.eq.s32.totalorder %s624_s14, 1 }
   0xd   : > { %p651_p10 = scmp.lt.s32.totalorder %s818_s12, 2  ;;  %s112_s23 = sand.u32 1, %s814_s11  }
   0xe   : > { %p890_p11 = por %p83_p7, %p32_p0  ;;  %p894_p12 = por %p89_p8, %p38_p3 }
   0xf   : > { %s638_s24 = sshll.u32 %s818_s12, 10  ;;  %s627_s25 = sshll.u32 %s112_s23, 6 }
  0x10   : > { %s1111_s21 = scalar_select %p890_p11, 1, 0 }
  0x11   : > { %s1112_s22 = scalar_select %p894_p12, 1, 0 }
  0x12   : > { %s903_s28 = scalar_lea.hbm %s1105_s0, %s638_s24  ;;  %s116_s29 = scalar_lea.vmem [#allocation2], %s627_s25 }
  0x13   : > { %s123_s30 = sshll.u32 %s116_s29, 4  ;;  %p907_p13 = pnand %p651_p10, %p879_p5  ;;  %s911_s30 = int_to_ptr.vmem [resolvable:$true] %s123_s30 }
  0x14   : > { %s913_s4 = scalar_lea.sflag [#allocation3], %s112_s23  ;;  %s722_s5 = scalar_lea.hbm %s903_s28, 1024 }
  0x15   : > { %p723_p0 = scmp.ne.s32.totalorder %s903_s28, %s722_s5  ;;  %p724_p1 = pneg %p907_p13 }
  0x16   : > { %s727_s8 = scalar_lea.hbm %s1105_s0, 2048  ;;  %p728_p4 = scmp.lt.u32.totalorder %s903_s28, %s1105_s0 }
  0x17   : > { %p725_p2 = pnand %p724_p1, %p723_p0  ;;  %p729_p5 = scmp.lt.u32.totalorder %s727_s8, %s722_s5 }
  0x18   : > { %p731_p8 = scmp.lt.u32.totalorder %s722_s5, %s903_s28 }
  0x19   : > { %p726_p3 = pneg %p725_p2  ;;  %p730_p7 = por %p729_p5, %p728_p4 }
  0x1b   : > { %p732_p10 = por %p731_p8, %p730_p7 }
  0x1d   : > { %p733_p9 = pnand %p732_p10, %p726_p3 }
  0x1f   : > { %736 = shalt.err (!%p733_p9)
}
  0x20   : > { %s737_s17 = scalar_lea.vmem %s911_s30, 1024  ;;  %s820_s19 = smov [#allocation2]  }
  0x21   : > { %p738_p0 = scmp.ne.s32.totalorder %s911_s30, %s737_s17  ;;  %s742_s23 = sshll.u32 %s820_s19, 4  ;;  %s743_s23 = int_to_ptr.vmem [resolvable:$false] %s742_s23 }
  0x22   : > { %s744_s24 = scalar_lea.vmem %s743_s23, 2048  ;;  %p745_p11 = scmp.lt.s32.totalorder %s911_s30, %s743_s23 }
  0x23   : > { %p740_p2 = pnand %p738_p0, %p724_p1  ;;  %p746_p4 = scmp.lt.s32.totalorder %s744_s24, %s737_s17 }
  0x25   : > { %p741_p12 = pneg %p740_p2  ;;  %p747_p5 = por %p746_p4, %p745_p11 }
  0x27   : > { %p748_p7 = pnand %p747_p5, %p741_p12 }
  0x29   : > { %751 = shalt.err (!%p748_p7)
}
  0x2a   : > { %s821_s25 = smov 128   ;;  %s822_s26 = smov 8  }
  0x2b   : > { %646 = dma.hbm_to_vmem [thread:$0]  (!%p907_p13), %s903_s28, 1024, %s911_s30, %s913_s4, %s821_s25, %s821_s25, %s822_s26  }
  0x2c   : > { %p630_p9 = scmp.ge.s32.totalorder %s818_s12, 1  ;;  %p131_p1 = scmp.lt.s32.totalorder %s818_s12, 3 }
  0x2e   : > { %p132_p3 = pnand %p630_p9, %p131_p1 }
  0x2f   : > { %s944_s27 = sand.u32 (!%p132_p3), 1, %s810_s10  }
  0x30   : > { %135 = sbr.rel (%p132_p3) target bundleno = 715 (0x2cb), region = 28  ;;  %s631_s29 = sshll.u32 (!%p132_p3), %s944_s27, 6 }
  0x31   : > { %s138_s5 = scalar_lea.sflag (!%p132_p3), [#allocation3], %s944_s27  ;;  %s141_s6 = scalar_lea.vmem (!%p132_p3), [#allocation2], %s631_s29 }
  0x37   : > { %797 = dma.done.wait (%p883_p6), %s138_s5, 1024  }
  0x38   : > { %799 = vsyncadd (%p883_p6), %s138_s5, 4294966272  ;;  %v952_v0 = vld [vmem:[%s141_s6] sm:$0xff]  ;;  %vm186_vm0 = vcmask 261120   ;;  %v957_v2 = vld [vmem:[%s141_s6 + $0x10] sm:$0xff]  ;;  %v219_v25 = vlaneseq  ;;  %vm253_vm1 = vcmask 1041409   ;;  %vm255_vm2 = vcmask 1042434  }
  0x39   : > { %v633_v1 = vld [vmem:[%s1106_s1] ss:$0 sm:$0xff]  ;;  %v961_v5 = vld [vmem:[%s141_s6 + $0x8] sm:$0xff]  ;;  %v963_v6 = vld [vmem:[%s141_s6 + $0x18] sm:$0xff]  ;;  %vm257_vm3 = vcmask 1043459   ;;  %vm259_vm4 = vcmask 1044484  }
  0x3a   : > { %v178_v3 = vmul.f32 %v633_v1, %v952_v0  ;;  %v180_v4 = vmul.f32 %v633_v1, %v957_v2  ;;  %v179_v7 = vmul.f32 %v633_v1, %v961_v5  ;;  %v181_v8 = vmul.f32 %v633_v1, %v963_v6  ;;  %v967_v9 = vld [vmem:[%s141_s6 + $0x20] sm:$0xff]  ;;  %v969_v10 = vld [vmem:[%s141_s6 + $0x28] sm:$0xff]  ;;  %v977_v17 = vld [vmem:[%s141_s6 + $0x30] sm:$0xff]  ;;  %s632_s20 = sshll.u32 %s944_s27, 3  ;;  %s635_s3 = sshll.u32 %s861_s13, 7 }
  0x3b   : > { %v182_v15 = vmul.f32 %v633_v1, %v967_v9  ;;  %v183_v16 = vmul.f32 %v633_v1, %v969_v10  ;;  %v979_v18 = vld [vmem:[%s141_s6 + $0x38] sm:$0xff]  ;;  %v184_v21 = vmul.f32 %v633_v1, %v977_v17  ;;  %v220_v26 = vand.u32 127, %v219_v25  ;;  %s161_s4 = scalar_lea.vmem [#allocation5], %s632_s20  ;;  %s1059_s16 = scalar_lea.hbm %s1107_s2, %s635_s3 }
  0x3c   : > { %v187_v11 = vsel %vm186_vm0, %v178_v3, 0.0  ;;  %v193_v12 = vsel %vm186_vm0, %v180_v4, 0.0  ;;  %v190_v13 = vsel %vm186_vm0, %v179_v7, 0.0  ;;  %v196_v14 = vsel %vm186_vm0, %v181_v8, 0.0  ;;  %s554_s7 = sshll.u32 %s161_s4, 4  ;;  %s541_s13 = scalar_lea.sflag [#allocation4], %s944_s27  ;;  %s1061_s7 = int_to_ptr.vmem [resolvable:$true] %s554_s7 }
  0x3d   : > { %188 = vadd.xlane.f32.xlu0 %v187_v11  ;;  %194 = vadd.xlane.f32.xlu1 %v193_v12  ;;  %v199_v19 = vsel %vm186_vm0, %v182_v15, 0.0  ;;  %v202_v20 = vsel %vm186_vm0, %v183_v16, 0.0  ;;  %v185_v22 = vmul.f32 %v633_v1, %v979_v18  ;;  %v205_v23 = vsel %vm186_vm0, %v184_v21, 0.0  ;;  %s752_s17 = scalar_lea.vmem %s1061_s7, 128  ;;  %p1114_p11 = scmp.ne.s32.totalorder %s1111_s21, 0 }
  0x3e   : > { %v987_v27 = vshrl.u32 %v219_v25, 7  ;;  %vm261_vm5 = vcmask 1045509   ;;  %vm263_vm6 = vcmask 1046534   ;;  %vm265_vm7 = vcmask 1047559   ;;  %p753_p6 = scmp.ne.s32.totalorder %s1061_s7, %s752_s17  ;;  %s824_s19 = smov [#allocation5]  }
  0x3f   : > { %v208_v24 = vsel %vm186_vm0, %v185_v22, 0.0  ;;  %vm268_vm8 = vcmask 64512   ;;  %v823_v53 = vmov 0   ;;  %s756_s23 = sshll.u32 %s824_s19, 4  ;;  %s757_s23 = int_to_ptr.vmem [resolvable:$false] %s756_s23 }
  0x40   : > { %v990_v30 = vsub.s32 %v220_v26, %v987_v27  ;;  %689 = vset.pattern.permute.xlu0 %v823_v53  ;;  %688 = vset.pattern.permute.xlu1 %v823_v53  ;;  %v275_v54 = vsub.s32 0, %v987_v27  ;;  %v279_v55 = vsub.s32 1, %v987_v27  ;;  %v283_v56 = vsub.s32 2, %v987_v27  ;;  %p754_p12 = pnand %p753_p6, %p1114_p11  ;;  %s758_s24 = scalar_lea.vmem %s757_s23, 256 }
  0x41   : > { %191 = vadd.xlane.f32.xlu0 %v190_v13  ;;  %197 = vadd.xlane.f32.xlu1 %v196_v14  ;;  %v287_v57 = vsub.s32 3, %v987_v27  ;;  %v291_v62 = vsub.s32 4, %v987_v27  ;;  %v295_v11 = vsub.s32 5, %v987_v27  ;;  %v299_v15 = vsub.s32 6, %v987_v27  ;;  %p759_p8 = scmp.lt.s32.totalorder %s1061_s7, %s757_s23  ;;  %p760_p10 = scmp.lt.s32.totalorder %s758_s24, %s752_s17 }
  0x42   : > { %v303_v21 = vsub.s32 7, %v987_v27  ;;  %p755_p13 = pneg %p754_p12 }
  0x43   : > { %p761_p0 = por %p760_p10, %p759_p8 }
  0x45   : > { %200 = vadd.xlane.f32.xlu0 %v199_v19  ;;  %203 = vadd.xlane.f32.xlu1 %v202_v20  ;;  %p762_p2 = pnand %p761_p0, %p755_p13 }
  0x49   : > { %206 = vadd.xlane.f32.xlu0 %v205_v23  ;;  %209 = vadd.xlane.f32.xlu1 %v208_v24 }
  0xca   : > { %v189_v28 = vpop.xlane.xlu0 %188  ;;  %v195_v29 = vpop.xlane.xlu1 %194 }
  0xcb   : > { %v224_v33 = vrot.slane %v189_v28, %v990_v30  ;;  %v232_v36 = vrot.slane %v195_v29, %v990_v30 }
  0xce   : > { %v192_v31 = vpop.xlane.xlu0 %191  ;;  %v198_v32 = vpop.xlane.xlu1 %197 }
  0xcf   : > { %v228_v34 = vrot.slane %v192_v31, %v990_v30  ;;  %v236_v35 = vrot.slane %v198_v32, %v990_v30 }
  0xd1   : > { %v254_v37 = vsel %vm253_vm1, %v228_v34, %v224_v33 }
  0xd2   : > { %v256_v38 = vsel %vm255_vm2, %v232_v36, %v254_v37  ;;  %v201_v39 = vpop.xlane.xlu0 %200  ;;  %v204_v40 = vpop.xlane.xlu1 %203 }
  0xd3   : > { %v258_v41 = vsel %vm257_vm3, %v236_v35, %v256_v38  ;;  %v240_v42 = vrot.slane %v201_v39, %v990_v30  ;;  %v244_v43 = vrot.slane %v204_v40, %v990_v30 }
  0xd5   : > { %v260_v44 = vsel %vm259_vm4, %v240_v42, %v258_v41 }
  0xd6   : > { %v207_v45 = vpop.xlane.xlu0 %206  ;;  %v210_v46 = vpop.xlane.xlu1 %209  ;;  %v262_v49 = vsel %vm261_vm5, %v244_v43, %v260_v44 }
  0xd7   : > { %v248_v47 = vrot.slane %v207_v45, %v990_v30  ;;  %v252_v48 = vrot.slane %v210_v46, %v990_v30 }
  0xd9   : > { %v264_v50 = vsel %vm263_vm6, %v248_v47, %v262_v49 }
  0xda   : > { %v266_v51 = vsel %vm265_vm7, %v252_v48, %v264_v50 }
  0xdb   : > { %v269_v52 = vsel %vm268_vm8, %v266_v51, -inf }
  0xdc   : > { %270 = vmax.xlane.f32.xlu0 %v269_v52 }
 0x169   : > { %v271_v58 = vpop.xlane.xlu0 %270 }
 0x16a   : > { %v276_v59 = vrot.slane %v271_v58, %v275_v54  ;;  %v280_v60 = vrot.slane %v271_v58, %v279_v55  ;;  %v284_v61 = vrot.slane %v271_v58, %v283_v56  ;;  %v288_v63 = vrot.slane %v271_v58, %v287_v57 }
 0x16b   : > { %v292_v12 = vrot.slane %v271_v58, %v291_v62  ;;  %v296_v16 = vrot.slane %v271_v58, %v295_v11  ;;  %v300_v22 = vrot.slane %v271_v58, %v299_v15 }
 0x16c   : > { %v313_v1 = vsub.f32 %v189_v28, %v276_v59  ;;  %v314_v3 = vsub.f32 %v192_v31, %v280_v60  ;;  %v315_v4 = vsub.f32 %v195_v29, %v284_v61  ;;  %v316_v13 = vsub.f32 %v198_v32, %v288_v63 }
 0x16d   : > { %v317_v19 = vsub.f32 %v201_v39, %v292_v12  ;;  %v318_v23 = vsub.f32 %v204_v40, %v296_v16  ;;  %v304_v28 = vrot.slane %v271_v58, %v303_v21  ;;  %v319_v29 = vsub.f32 %v207_v45, %v300_v22 }
 0x16e   : > { %v321_v7 = vmul.f32 1.442695, %v313_v1  ;;  %v323_v8 = vmul.f32 1.442695, %v314_v3  ;;  %v325_v14 = vmul.f32 1.442695, %v315_v4 }
 0x16f   : > { %v327_v20 = vmul.f32 1.442695, %v316_v13  ;;  %v329_v24 = vmul.f32 1.442695, %v317_v19  ;;  %v331_v31 = vmul.f32 1.442695, %v318_v23  ;;  %v320_v33 = vsub.f32 %v210_v46, %v304_v28 }
 0x170   : > { %690 = vpow2.f32 %v321_v7  ;;  %v333_v34 = vmul.f32 1.442695, %v319_v29 }
 0x171   : > { %692 = vpow2.f32 %v323_v8  ;;  %v335_v27 = vmul.f32 1.442695, %v320_v33 }
 0x172   : > { %694 = vpow2.f32 %v325_v14 }
 0x173   : > { %696 = vpow2.f32 %v327_v20 }
 0x174   : > { %698 = vpow2.f32 %v329_v24 }
 0x175   : > { %700 = vpow2.f32 %v331_v31 }
 0x176   : > { %702 = vpow2.f32 %v333_v34 }
 0x177   : > { %704 = vpow2.f32 %v335_v27 }
 0x17a   : > { %v691_v25 = vpop.eup %690 }
 0x17b   : > { %v693_v26 = vpop.eup %692  ;;  %346 = vperm.xlu1 %688, %v691_v25  }
 0x17c   : > { %349 = vperm.xlu0 %689, %v693_v26   ;;  %v695_v32 = vpop.eup %694 }
 0x17d   : > { %v697_v35 = vpop.eup %696 }
 0x17e   : > { %v699_v36 = vpop.eup %698 }
 0x17f   : > { %352 = vperm.xlu1 %688, %v695_v32   ;;  %v701_v37 = vpop.eup %700 }
 0x180   : > { %v703_v38 = vpop.eup %702 }
 0x181   : > { %v705_v39 = vpop.eup %704 }
 0x183   : > { %355 = vperm.xlu1 %688, %v697_v35  }
 0x187   : > { %358 = vperm.xlu1 %688, %v699_v36  }
 0x18b   : > { %361 = vperm.xlu1 %688, %v701_v37  }
 0x18f   : > { %364 = vperm.xlu1 %688, %v703_v38  }
 0x193   : > { %367 = vperm.xlu1 %688, %v705_v39  }
 0x1fa   : > { %v347_v40 = vpop.permute.xlu1 %346 }
 0x1fb   : > { %v350_v44 = vpop.permute.xlu0 %349  ;;  %v372_v47 = vrot.slane %v347_v40, %v990_v30  ;;  %v420_v3 = vmul.f32 %v347_v40, %v952_v0 }
 0x1fc   : > { %v376_v46 = vrot.slane %v350_v44, %v990_v30  ;;  %v421_v1 = vmul.f32 %v350_v44, %v961_v5 }
 0x1fd   : > { %v428_v11 = vsel %vm186_vm0, %v420_v3, 0.0 }
 0x1fe   : > { %v353_v41 = vpop.permute.xlu1 %352  ;;  %v401_v52 = vsel %vm253_vm1, %v376_v46, %v372_v47 }
 0x1ff   : > { %v380_v48 = vrot.slane %v353_v41, %v990_v30  ;;  %v422_v4 = vmul.f32 %v353_v41, %v957_v2  ;;  %v429_v2 = vrot.slane %v428_v11, 4 }
 0x201   : > { %v402_v54 = vsel %vm255_vm2, %v380_v48, %v401_v52  ;;  %v442_v12 = vsel %vm186_vm0, %v422_v4, 0.0  ;;  %v430_v23 = vadd.f32 %v429_v2, %v428_v11 }
 0x202   : > { %v356_v42 = vpop.permute.xlu1 %355  ;;  %v443_v16 = vrot.slane %v442_v12, 4 }
 0x203   : > { %v384_v49 = vrot.slane %v356_v42, %v990_v30  ;;  %v423_v7 = vmul.f32 %v356_v42, %v963_v6  ;;  %v431_v31 = vrot.slane %v430_v23, 2 }
 0x205   : > { %v403_v56 = vsel %vm257_vm3, %v384_v49, %v402_v54  ;;  %v449_v5 = vsel %vm186_vm0, %v423_v7, 0.0  ;;  %v432_v49 = vadd.f32 %v431_v31, %v430_v23 }
 0x206   : > { %v359_v43 = vpop.permute.xlu1 %358  ;;  %v450_v19 = vrot.slane %v449_v5, 4 }
 0x207   : > { %v388_v50 = vrot.slane %v359_v43, %v990_v30  ;;  %v424_v8 = vmul.f32 %v359_v43, %v967_v9 }
 0x208   : > { %v451_v26 = vadd.f32 %v450_v19, %v449_v5 }
 0x209   : > { %v404_v57 = vsel %vm259_vm4, %v388_v50, %v403_v56  ;;  %v456_v6 = vsel %vm186_vm0, %v424_v8, 0.0 }
 0x20a   : > { %v362_v45 = vpop.permute.xlu1 %361  ;;  %v457_v21 = vrot.slane %v456_v6, 4  ;;  %v452_v38 = vrot.slane %v451_v26, 2 }
 0x20b   : > { %v392_v53 = vrot.slane %v362_v45, %v990_v30  ;;  %v425_v13 = vmul.f32 %v362_v45, %v969_v10 }
 0x20c   : > { %v458_v28 = vadd.f32 %v457_v21, %v456_v6  ;;  %v453_v50 = vadd.f32 %v452_v38, %v451_v26 }
 0x20d   : > { %v405_v60 = vsel %vm261_vm5, %v392_v53, %v404_v57  ;;  %v463_v9 = vsel %vm186_vm0, %v425_v13, 0.0  ;;  %v433_v57 = vrot.slane %v432_v49, 1 }
 0x20e   : > { %v365_v51 = vpop.permute.xlu1 %364  ;;  %v464_v24 = vrot.slane %v463_v9, 4  ;;  %v459_v41 = vrot.slane %v458_v28, 2 }
 0x20f   : > { %v396_v55 = vrot.slane %v365_v51, %v990_v30  ;;  %v426_v14 = vmul.f32 %v365_v51, %v977_v17  ;;  %v444_v17 = vadd.f32 %v443_v16, %v442_v12  ;;  %v434_v8 = vadd.f32 %v433_v57, %v432_v49 }
 0x210   : > { %v465_v33 = vadd.f32 %v464_v24, %v463_v9  ;;  %v460_v52 = vadd.f32 %v459_v41, %v458_v28 }
 0x211   : > { %v406_v61 = vsel %vm263_vm6, %v396_v55, %v405_v60  ;;  %v470_v20 = vsel %vm186_vm0, %v426_v14, 0.0  ;;  %v445_v32 = vrot.slane %v444_v17, 2 }
 0x212   : > { %v368_v58 = vpop.permute.xlu1 %367  ;;  %v471_v25 = vrot.slane %v470_v20, 4  ;;  %v466_v44 = vrot.slane %v465_v33, 2  ;;  %v461_v60 = vrot.slane %v460_v52, 1 }
 0x213   : > { %v400_v59 = vrot.slane %v368_v58, %v990_v30  ;;  %v435_v30 = vsel %vm186_vm0, %v421_v1, 0.0  ;;  %v427_v0 = vmul.f32 %v368_v58, %v979_v18  ;;  %v446_v46 = vadd.f32 %v445_v32, %v444_v17 }
 0x214   : > { %v436_v15 = vrot.slane %v435_v30, 4  ;;  %v472_v35 = vadd.f32 %v471_v25, %v470_v20  ;;  %v467_v54 = vadd.f32 %v466_v44, %v465_v33  ;;  %v454_v58 = vrot.slane %v453_v50, 1 }
 0x215   : > { %v407_v62 = vsel %vm265_vm7, %v400_v59, %v406_v61  ;;  %v477_v22 = vsel %vm186_vm0, %v427_v0, 0.0  ;;  %v447_v55 = vrot.slane %v446_v46, 1  ;;  %v462_v14 = vadd.f32 %v461_v60, %v460_v52 }
 0x216   : > { %v409_v63 = vsel %vm268_vm8, %v407_v62, 0.0  ;;  %v437_v10 = vadd.f32 %v436_v15, %v435_v30  ;;  %v478_v18 = vrot.slane %v477_v22, 4  ;;  %v473_v47 = vrot.slane %v472_v35, 2 }
 0x217   : > { %410 = vadd.xlane.f32.xlu1 %v409_v63  ;;  %v468_v63 = vrot.slane %v467_v54, 1  ;;  %v448_v3 = vadd.f32 %v447_v55, %v446_v46  ;;  %v455_v30 = vadd.f32 %v454_v58, %v453_v50 }
 0x218   : > { %v438_v29 = vrot.slane %v437_v10, 2  ;;  %v479_v39 = vadd.f32 %v478_v18, %v477_v22  ;;  %v474_v56 = vadd.f32 %v473_v47, %v472_v35 }
 0x219   : > { %v469_v15 = vadd.f32 %v468_v63, %v467_v54 }
 0x21a   : > { %v439_v43 = vadd.f32 %v438_v29, %v437_v10  ;;  %v480_v51 = vrot.slane %v479_v39, 2  ;;  %v475_v4 = vrot.slane %v474_v56, 1 }
 0x21c   : > { %v440_v53 = vrot.slane %v439_v43, 1  ;;  %v481_v59 = vadd.f32 %v480_v51, %v479_v39  ;;  %v476_v19 = vadd.f32 %v475_v4, %v474_v56 }
 0x21e   : > { %v441_v62 = vadd.f32 %v440_v53, %v439_v43  ;;  %v482_v11 = vrot.slane %v481_v59, 1 }
 0x220   : > { %v483_v10 = vadd.f32 %v482_v11, %v481_v59 }
 0x2a4   : > { %v411_v34 = vpop.xlane.xlu1 %410 }
 0x2a5   : > { %v485_v27 = vrot.slane %v411_v34, 1  ;;  %v486_v36 = vrot.slane %v411_v34, 2  ;;  %v487_v37 = vrot.slane %v411_v34, 3  ;;  %v488_v40 = vrot.slane %v411_v34, 4 }
 0x2a6   : > { %706 = vrcp.f32 %v411_v34  ;;  %v489_v42 = vrot.slane %v411_v34, 5  ;;  %v490_v45 = vrot.slane %v411_v34, 6  ;;  %v491_v48 = vrot.slane %v411_v34, 7 }
 0x2a7   : > { %708 = vrcp.f32 %v485_v27 }
 0x2a8   : > { %710 = vrcp.f32 %v486_v36 }
 0x2a9   : > { %712 = vrcp.f32 %v487_v37 }
 0x2aa   : > { %714 = vrcp.f32 %v488_v40 }
 0x2ab   : > { %716 = vrcp.f32 %v489_v42 }
 0x2ac   : > { %718 = vrcp.f32 %v490_v45 }
 0x2ad   : > { %720 = vrcp.f32 %v491_v48 }
 0x2b0   : > { %v707_v61 = vpop.eup %706 }
 0x2b1   : > { %v709_v1 = vpop.eup %708  ;;  %v501_v2 = vmul.f32 %v707_v61, %v434_v8 }
 0x2b2   : > { %v711_v7 = vpop.eup %710  ;;  %v503_v12 = vmul.f32 %v709_v1, %v441_v62 }
 0x2b3   : > { %v713_v13 = vpop.eup %712  ;;  %v505_v5 = vmul.f32 %v711_v7, %v448_v3 }
 0x2b4   : > { %v715_v0 = vpop.eup %714  ;;  %v524_v16 = vrot.slane %v503_v12, 7  ;;  %v507_v6 = vmul.f32 %v713_v13, %v455_v30 }
 0x2b5   : > { %v717_v9 = vpop.eup %716  ;;  %v509_v20 = vmul.f32 %v715_v0, %v462_v14  ;;  %v526_v21 = vrot.slane %v505_v5, 6 }
 0x2b6   : > { %v719_v22 = vpop.eup %718  ;;  %v511_v23 = vmul.f32 %v717_v9, %v469_v15  ;;  %v525_v17 = vsel %vm253_vm1, %v524_v16, %v501_v2  ;;  %v528_v24 = vrot.slane %v507_v6, 5 }
 0x2b7   : > { %v721_v25 = vpop.eup %720  ;;  %v513_v26 = vmul.f32 %v719_v22, %v476_v19  ;;  %v527_v18 = vsel %vm255_vm2, %v526_v21, %v525_v17  ;;  %v530_v28 = vrot.slane %v509_v20, 4 }
 0x2b8   : > { %v515_v29 = vmul.f32 %v721_v25, %v483_v10  ;;  %v529_v31 = vsel %vm257_vm3, %v528_v24, %v527_v18  ;;  %v532_v32 = vrot.slane %v511_v23, 3 }
 0x2b9   : > { %v531_v33 = vsel %vm259_vm4, %v530_v28, %v529_v31  ;;  %v534_v34 = vrot.slane %v513_v26, 2 }
 0x2ba   : > { %v533_v35 = vsel %vm261_vm5, %v532_v32, %v531_v33  ;;  %v536_v27 = vrot.slane %v515_v29, 1 }
 0x2bb   : > { %v535_v36 = vsel %vm263_vm6, %v534_v34, %v533_v35 }
 0x2bc   : > { %v537_v37 = vsel %vm265_vm7, %v536_v27, %v535_v36 }
 0x2bd   : > { %539 = vst.msk [vmem:[%s161_s4] sm:$0xff] %vm186_vm0, %v537_v37 }
 0x2be   : > { %765 = shalt.err (!%p762_p2)
}
 0x2bf   : > { %s766_s25 = scalar_lea.hbm %s1059_s16, 128  ;;  %s770_s29 = scalar_lea.hbm %s1107_s2, 256 }
 0x2c0   : > { %p767_p4 = scmp.ne.s32.totalorder %s1059_s16, %s766_s25  ;;  %p771_p9 = scmp.lt.u32.totalorder %s1059_s16, %s1107_s2 }
 0x2c1   : > { %p772_p1 = scmp.lt.u32.totalorder %s770_s29, %s766_s25  ;;  %p774_p6 = scmp.lt.u32.totalorder %s766_s25, %s1059_s16 }
 0x2c2   : > { %p768_p5 = pnand %p767_p4, %p1114_p11 }
 0x2c3   : > { %p773_p3 = por %p772_p1, %p771_p9 }
 0x2c4   : > { %p769_p7 = pneg %p768_p5 }
 0x2c5   : > { %p775_p12 = por %p774_p6, %p773_p3 }
 0x2c7   : > { %p776_p13 = pnand %p775_p12, %p769_p7 }
 0x2c9   : > { %779 = shalt.err (!%p776_p13)
}
 0x2ca   : > { %641 = dma.vmem_to_hbm [thread:$0]  (%p1114_p11), %s1061_s7, 128, %s1059_s16, %s541_s13  }
 0x2cb PF: > { %s566_s28 = sand.u32 1, %s806_s9   ;;  %p1115_p8 = scmp.ne.s32.totalorder %s1112_s22, 0 }
 0x2cc   : > { %p1116_p10 = scmp.ge.s32.totalorder %s818_s12, 2  ;;  %s567_s30 = scalar_lea.sflag [#allocation4], %s566_s28 }
 0x2ce   : > { %p648_p0 = pnand %p1116_p10, %p1115_p8 }
 0x2d0   : > { %801 = dma.done.wait (!%p648_p0), %s567_s30, 128  }
 0x2d1   : > { %803 = vsyncadd (!%p648_p0), %s567_s30, 4294967168  ;;  %p15_p2 = scmp.ge.s32.totalorder %s865_s15, 4   ;;  %s1117_s9 = smov %s810_s10 }
 0x2d2   : > { %s1118_s10 = smov %s814_s11  ;;  %s1119_s11 = smov %s877_s18 }
 0x2d3   : > { %s1120_s12 = smov %s865_s15  ;;  %17 = sbr.rel (!%p15_p2) target bundleno = 5 (0x5), region = 73 }
 0x2da   :  { %572 = vsyncpa [#allocation3], 1 }
 0x2db   :  { %574 = vsyncpa [#allocation3 + $0x1], 1 }
 0x2dc   :  { %575 = vsyncpa [#allocation4], 1 }
 0x2dd   :  { %577 = vsyncpa [#allocation4 + $0x1], 1 }

</bundles_post_ra>
